<compile_context>
chip_gen: v5e
topology: v5e:2x2
jax: 0.10.0
libtpu: 0.0.40
codegen_flags: <defaults>
</compile_context>

<pallas_src>
import functools

import jax
import jax.numpy as jnp
import numpy as np
from jax.experimental import pallas as pl
from jax.experimental.pallas import tpu as pltpu


def _round_up(n: int, m: int) -> int:
    return ((n + m - 1) // m) * m


def _round_down(n: int, m: int) -> int:
    return (n // m) * m


# HBM-bound row LayerNorm: size the input tile by bytes, cap by VMEM residency.
_TARGET_TILE_BYTES = 4 << 20      # ~4 MiB input tile (>=85% of HBM roofline)
_VMEM_LIMIT_BYTES = 32 << 20      # explicit scoped-VMEM request (OK on v5e/v6e/v7x)
_VMEM_RESIDENT_BUDGET = 28 << 20  # 2 bufs x (in+out) + f32 work tile, w/ headroom


def _choose_tile_rows(M: int, D: int, itemsize: int, sub: int) -> int:
    """Row-tile size: byte-budget driven, VMEM-capped, >=2 grid steps when possible."""
    row_bytes = D * itemsize
    # Target ~4 MiB of input per grid step.
    tm = max(sub, _round_down(_TARGET_TILE_BYTES // row_bytes, sub))
    # VMEM residency per step: 2 bufs x (in + out) tiles + one f32 working tile.
    resident_per_row = 4 * row_bytes + 4 * D
    tm_vmem = max(sub, _round_down(_VMEM_RESIDENT_BUDGET // resident_per_row, sub))
    tm = min(tm, tm_vmem)
    # Keep at least 2 grid steps so the "parallel" axis shards across v7x's 2 TCs.
    tm = min(tm, _round_up((M + 1) // 2, sub))
    # Never (much) larger than the problem itself.
    tm = min(tm, _round_up(M, sub))
    return max(tm, sub)


def _layernorm_kernel(alpha_ref, beta_ref, x_ref, o_ref, *, eps: float):
    """Torch-style LayerNorm (ddof=1 std, eps added to std) over the lane axis."""
    x = x_ref[...].astype(jnp.float32)                       # (tm, D)
    d = x.shape[-1]

    # One-pass statistics: two XLU row reductions, ~3 VALU ops/element total
    # (square + final FMA, plus casts); no materialized (tm, D) centered tile.
    s1 = jnp.sum(x, axis=-1, keepdims=True)                   # (tm, 1)
    s2 = jnp.sum(x * x, axis=-1, keepdims=True)               # (tm, 1)
    mean = s1 * (1.0 / d)
    # Unbiased (ddof=1) variance, torch.Tensor.std default:
    #   sum((x - mean)^2) == s2 - mean * s1.  Clamp tiny negatives from f32
    #   cancellation.
    # TODO(synk): D == 1 divides by zero here, exactly as torch.std(ddof=1) does.
    var = jnp.maximum(s2 - mean * s1, 0.0) * (1.0 / (d - 1))
    std = jnp.sqrt(var)

    # One reciprocal per ROW; alpha and the mean shift are folded in so the
    # per-element epilogue is a single FMA: x * scale + shift.
    scale = alpha_ref[0] * pl.reciprocal(std + eps, approx=False)   # (tm, 1)
    shift = beta_ref[0] - mean * scale                              # (tm, 1)
    o_ref[...] = (x * scale + shift).astype(o_ref.dtype)


@functools.partial(jax.jit, static_argnames=("eps",))
def layer_norm(x, alpha, beta, *, eps=1e-6):
    """alpha * (x - mean) / (std + eps) + beta over the last axis of x."""
    orig_shape = x.shape
    D = int(orig_shape[-1])
    M = 1
    for s in orig_shape[:-1]:
        M *= int(s)
    x2 = x.reshape(M, D)

    itemsize = jnp.dtype(x2.dtype).itemsize
    sub = 16 if itemsize < 4 else 8            # sublane grain (bf16 packs 16 rows)
    tm = _choose_tile_rows(M, D, itemsize, sub)
    grid = (pl.cdiv(M, tm),)                   # partial last block handled by Pallas
                                               # (no jnp.pad / out-slice HBM passes)

    alpha_arr = jnp.asarray(alpha, jnp.float32).reshape(1)
    beta_arr = jnp.asarray(beta, jnp.float32).reshape(1)

    cost = pl.CostEstimate(
        flops=6 * M * D,                # reductions, square, FMA epilogue
        transcendentals=2 * M,          # sqrt + reciprocal per row
        bytes_accessed=2 * M * D * itemsize,
    )

    out = pl.pallas_call(
        functools.partial(_layernorm_kernel, eps=float(eps)),
        out_shape=jax.ShapeDtypeStruct((M, D), x.dtype),
        grid=grid,
        in_specs=[
            pl.BlockSpec(memory_space=pltpu.MemorySpace.SMEM),   # alpha (scalar)
            pl.BlockSpec(memory_space=pltpu.MemorySpace.SMEM),   # beta  (scalar)
            pl.BlockSpec((tm, D), lambda i: (i, 0)),             # x row tile
        ],
        out_specs=pl.BlockSpec((tm, D), lambda i: (i, 0)),
        compiler_params=pltpu.CompilerParams(
            dimension_semantics=("parallel",),        # split row blocks on v7x's 2 TCs
            vmem_limit_bytes=_VMEM_LIMIT_BYTES,
        ),
        cost_estimate=cost,
        # TODO(synk): allow_input_fusion on the x operand could fuse the last
        # decoder layer's elementwise epilogue into the kernel's input read.
    )(alpha_arr, beta_arr, x2)

    return out.reshape(orig_shape)


def decoder_forward(x, encoder_output, src_mask, tgt_mask, layers,
                    alpha, beta, *, eps=1e-6):
    """Decoder.forward: apply the (opaque) layer stack, then the Pallas LayerNorm."""
    # TODO(synk): the DecoderBlock stack is injected as an opaque nn.ModuleList in
    # the PyTorch spec (no definition provided), so each layer is treated as an
    # arbitrary JAX callable here; only the final LayerNormalization runs in Pallas.
    for layer in layers:
        x = layer(x, encoder_output, src_mask, tgt_mask)
    return layer_norm(x, alpha, beta, eps=eps)


def _reference_layernorm(x, alpha, beta, eps):
    mean = jnp.mean(x, axis=-1, keepdims=True)
    c = x - mean
    var = jnp.sum(c * c, axis=-1, keepdims=True) / (x.shape[-1] - 1)
    std = jnp.sqrt(var)
    return alpha * c / (std + eps) + beta


if __name__ == "__main__":
    # (batch, seq, hidden); seq chosen off the 8-row grain so M % tm != 0 and the
    # partial-last-block (no-padding) path is exercised.
    B, S, D = 2, 9, 128
    key = jax.random.PRNGKey(0)
    kx, ke = jax.random.split(key)

    x = jax.random.normal(kx, (B, S, D), dtype=jnp.float32)
    enc = jax.random.normal(ke, (B, S, D), dtype=jnp.float32)
    src_mask = jnp.ones((B, 1, 1, S), dtype=jnp.float32)
    tgt_mask = jnp.tril(jnp.ones((S, S), dtype=jnp.float32))[None, None]

    # LayerNormalization params: torch.ones(1) for both alpha and bias.
    alpha = jnp.ones((), jnp.float32)
    beta = jnp.ones((), jnp.float32)
    eps = 1e-6

    # Stand-in decoder layers: the real DecoderBlocks are opaque in the spec,
    # so use simple JAX callables with the same call signature.
    def toy_layer(h, enc_out, src_m, tgt_m):
        return h + 0.5 * enc_out

    layers = (toy_layer, toy_layer)

    out = decoder_forward(x, enc, src_mask, tgt_mask, layers, alpha, beta, eps=eps)
    jax.block_until_ready(out)

    # Pure-JAX reference of the full Decoder forward.
    x_ref = x
    for layer in layers:
        x_ref = layer(x_ref, enc, src_mask, tgt_mask)
    ref = _reference_layernorm(x_ref, 1.0, 1.0, eps)
    np.testing.assert_allclose(np.asarray(out), np.asarray(ref),
                               rtol=1e-4, atol=1e-4)

    # A second f32 shape with multiple grid steps and a non-divisible row count.
    x_big = jax.random.normal(jax.random.PRNGKey(1), (4, 300, 256), jnp.float32)
    out_big = layer_norm(x_big, alpha, beta, eps=eps)
    jax.block_until_ready(out_big)
    ref_big = _reference_layernorm(x_big, 1.0, 1.0, eps)
    np.testing.assert_allclose(np.asarray(out_big), np.asarray(ref_big),
                               rtol=1e-4, atol=1e-4)

    # bf16 I/O path (stats stay f32 inside the kernel): compare loosely vs. the
    # f32 reference (input/output rounding dominates the error).
    out_bf16 = decoder_forward(x.astype(jnp.bfloat16), enc.astype(jnp.bfloat16),
                               src_mask, tgt_mask, layers, alpha, beta, eps=eps)
    jax.block_until_ready(out_bf16)
    assert bool(jnp.all(jnp.isfinite(out_bf16.astype(jnp.float32))))
    np.testing.assert_allclose(np.asarray(out_bf16, dtype=np.float32),
                               np.asarray(ref), rtol=1e-1, atol=1e-1)

    print("KERNEL_OK")
</pallas_src>

<mosaic_0001>
module attributes {stable_mosaic.version = 11 : i64} {
  func.func @_layernorm_kernel(%arg0: i32, %arg1: memref<1xf32, #tpu.memory_space<smem>>, %arg2: memref<1xf32, #tpu.memory_space<smem>>, %arg3: memref<16x128xf32, #tpu.memory_space<vmem>>, %arg4: memref<16x128xf32, #tpu.memory_space<vmem>>) attributes {dimension_semantics = [#tpu.dimension_semantics<parallel>], iteration_bounds = array<i64: 2>, scalar_prefetch = 0 : i64, scratch_operands = 0 : i64, tpu.core_type = #tpu.core_type<tc>, window_params = [{transform_indices = @transform_0, window_bounds = array<i64: 1>}, {transform_indices = @transform_1, window_bounds = array<i64: 1>}, {transform_indices = @transform_2, window_bounds = array<i64: 16, 128>}, {transform_indices = @transform_3, window_bounds = array<i64: 16, 128>}]} {
    %c0 = arith.constant 0 : index
    %c0_0 = arith.constant 0 : index
    %0 = vector.load %arg3[%c0, %c0_0] : memref<16x128xf32, #tpu.memory_space<vmem>>, vector<16x128xf32>
    %cst = arith.constant dense<0.000000e+00> : vector<16xf32>
    %1 = vector.multi_reduction <add>, %0, %cst [1] : vector<16x128xf32> to vector<16xf32>
    %2 = vector.shape_cast %1 : vector<16xf32> to vector<16x1xf32>
    %3 = arith.mulf %0, %0 : vector<16x128xf32>
    %cst_1 = arith.constant dense<0.000000e+00> : vector<16xf32>
    %4 = vector.multi_reduction <add>, %3, %cst_1 [1] : vector<16x128xf32> to vector<16xf32>
    %5 = vector.shape_cast %4 : vector<16xf32> to vector<16x1xf32>
    %cst_2 = arith.constant 7.812500e-03 : f32
    %6 = vector.broadcast %cst_2 : f32 to vector<16x1xf32>
    %7 = arith.mulf %2, %6 : vector<16x1xf32>
    %8 = arith.mulf %7, %2 : vector<16x1xf32>
    %9 = arith.subf %5, %8 : vector<16x1xf32>
    %cst_3 = arith.constant 0.000000e+00 : f32
    %10 = vector.broadcast %cst_3 : f32 to vector<16x1xf32>
    %11 = arith.maximumf %9, %10 : vector<16x1xf32>
    %cst_4 = arith.constant 0.00787401571 : f32
    %12 = vector.broadcast %cst_4 : f32 to vector<16x1xf32>
    %13 = arith.mulf %11, %12 : vector<16x1xf32>
    %14 = math.sqrt %13 : vector<16x1xf32>
    %c0_5 = arith.constant 0 : index
    %15 = memref.load %arg1[%c0_5] : memref<1xf32, #tpu.memory_space<smem>>
    %cst_6 = arith.constant 9.99999997E-7 : f32
    %16 = vector.broadcast %cst_6 : f32 to vector<16x1xf32>
    %17 = arith.addf %14, %16 : vector<16x1xf32>
    %18 = tpu.reciprocal %17 : vector<16x1xf32> -> vector<16x1xf32>
    %19 = vector.broadcast %15 : f32 to vector<16x1xf32>
    %20 = arith.mulf %19, %18 : vector<16x1xf32>
    %c0_7 = arith.constant 0 : index
    %21 = memref.load %arg2[%c0_7] : memref<1xf32, #tpu.memory_space<smem>>
    %22 = arith.mulf %7, %20 : vector<16x1xf32>
    %23 = vector.broadcast %21 : f32 to vector<16x1xf32>
    %24 = arith.subf %23, %22 : vector<16x1xf32>
    %25 = vector.broadcast %20 : vector<16x1xf32> to vector<16x128xf32>
    %26 = arith.mulf %0, %25 : vector<16x128xf32>
    %27 = vector.broadcast %24 : vector<16x1xf32> to vector<16x128xf32>
    %28 = arith.addf %26, %27 : vector<16x128xf32>
    %c0_8 = arith.constant 0 : index
    %c0_9 = arith.constant 0 : index
    %29 = vector.load %arg4[%c0_8, %c0_9] : memref<16x128xf32, #tpu.memory_space<vmem>>, vector<16x128xf32>
    tpu.vector_store %arg4[%c0_8, %c0_9], %28 {strides = array<i32>} : memref<16x128xf32, #tpu.memory_space<vmem>>, vector<16x128xf32>,
    return
  }
  func.func @transform_0(%arg0: i32) -> i32 {
    %c0_i32 = arith.constant 0 : i32
    %c0_i32_0 = arith.constant 0 : i32
    return %c0_i32 : i32
  }
  func.func @transform_1(%arg0: i32) -> i32 {
    %c0_i32 = arith.constant 0 : i32
    %c0_i32_0 = arith.constant 0 : i32
    return %c0_i32 : i32
  }
  func.func @transform_2(%arg0: i32) -> (i32, i32) {
    %c0_i32 = arith.constant 0 : i32
    %c0_i32_0 = arith.constant 0 : i32
    return %arg0, %c0_i32 : i32, i32
  }
  func.func @transform_3(%arg0: i32) -> (i32, i32) {
    %c0_i32 = arith.constant 0 : i32
    %c0_i32_0 = arith.constant 0 : i32
    return %arg0, %c0_i32 : i32, i32
  }
}

</mosaic_0001>

<bundles_post_ra>
// kernel: layer_norm.1
= control target key start
LH: loop header
LB: loop body
LE: loop exit
PB: predicated region body
PF: predicated region fallthrough
CT: control target
= control target key end

     0   :  { %s852_s0 = inlined_call_operand.<no memory space> [shape: f32[1], index: 0, kind: input, shape index: {}]   ;;  %s853_s1 = inlined_call_operand.<no memory space> [shape: f32[1], index: 1, kind: input, shape index: {}]   ;;  %s854_s2 = inlined_call_operand.vmem [shape: f32[18,128], index: 2, kind: input, shape index: {}]   ;;  %s855_s3 = inlined_call_operand.vmem [shape: f32[18,128], index: 3, kind: output, shape index: {}]  }
   0x1   :  { %8 = sst [smem:[#allocation2]] %s852_s0 }
   0x2   :  { %9 = sst [smem:[#allocation3]] %s853_s1 }
   0x3   :  { %s743_s16 = smov 0   ;;  %s745_s17 = smov 0  }
   0x4   :  { %s747_s18 = smov 0  }
   0x5 LB: > { %s756_s0 = sadd.s32 4294967295, %s683_s18   ;;  %s758_s1 = sadd.s32 1, %s683_s18   ;;  %s683_s18 = sphi %s747_s18, %s859_s18   ;;  %s679_s17 = sphi %s745_s17, %s858_s17   ;;  %s675_s16 = sphi %s743_s16, %s857_s16  }
   0x6   : > { %s87_s19 = ssub.s32 %s683_s18, %s758_s1  ;;  %s90_s20 = sadd.s32 1, %s679_s17 }
   0x7   : > { %p88_p0 = scmp.eq.s32.totalorder %s87_s19, 0  ;;  %p100_p1 = scmp.ne.s32.totalorder %s679_s17, %s675_s16 }
   0x8   : > { %p101_p2 = scmp.eq.s32.totalorder %s756_s0, 1  ;;  %p509_p3 = scmp.ge.s32.totalorder %s683_s18, 1 }
   0x9   : > { %s766_s21 = scalar_select %p88_p0, %s679_s17, %s90_s20  }
   0xa   : > { %p768_p4 = por %p101_p2, %p100_p1  ;;  %p148_p5 = scmp.lt.s32.totalorder %s683_s18, 3 }
   0xc   : > { %p149_p6 = pnand %p509_p3, %p148_p5 }
   0xd   : > { %s773_s23 = sshll.u32 (!%p149_p6), %s756_s0, 1  ;;  %s796_s29 = sld [smem:[#allocation2]] (!%p149_p6) }
   0xe   : > { %152 = sbr.rel (%p149_p6) target bundleno = 246 (0xf6), region = 32  ;;  %p180_p7 = scmp.lt.s32.totalorder (!%p149_p6), %s773_s23, 2 }
   0xf   : > { %s798_s30 = sld [smem:[#allocation3]] (!%p149_p6)  ;;  %s172_s4 = sand.u32 (!%p149_p6), 1, %s675_s16  }
  0x10   : > { %s510_s5 = sshll.u32 (!%p149_p6), %s172_s4, 4 }
  0x11   : > { %s805_s6 = scalar_lea.vmem (!%p149_p6), [#allocation4], %s510_s5  }
  0x13   : > { %s181_s24 = scalar_select %p180_p7, %s773_s23, 2  ;;  %v271_v47 = vstv %s796_s29 }
  0x14   : > { %s294_s7 = ssub.s32 (%p768_p4), 3, %s773_s23  ;;  %s530_s8 = sshll.u32 (%p768_p4), %s756_s0, 4 }
  0x15   : > { %s512_s25 = sshll.u32 %s181_s24, 3  ;;  %v277_v54 = vstv %s798_s30  ;;  %p295_p8 = scmp.lt.s32.totalorder (%p768_p4), %s294_s7, 2 }
  0x16   : > { %s183_s28 = scalar_lea.vmem %s854_s2, %s512_s25  ;;  %s818_s11 = scalar_lea.vmem (%p768_p4), %s855_s3, %s530_s8  }
  0x17   : > { %v780_v0 = vld [vmem:[%s183_s28] sm:$0xff]  ;;  %v785_v2 = vld [vmem:[%s183_s28 + $0x8] sm:$0xff] }
  0x18   : > { %196 = vadd.xlane.f32.xlu0 %v780_v0  ;;  %v200_v1 = vmul.f32 %v780_v0, %v780_v0  ;;  %v201_v3 = vmul.f32 %v785_v2, %v785_v2 }
  0x1a   : > { %202 = vadd.xlane.f32.xlu1 %v200_v1 }
  0x20   : > { %198 = vadd.xlane.f32.xlu0 %v785_v2 }
  0x22   : > { %204 = vadd.xlane.f32.xlu1 %v201_v3 }
  0x8b   : > { %v197_v4 = vpop.xlane.xlu0 %196 }
  0x8c   : > { %v790_v5 = vmul.f32 0.0078125, %v197_v4 }
  0x8d   : > { %v203_v6 = vpop.xlane.xlu1 %202 }
  0x8e   : > { %v208_v7 = vmul.f32 %v790_v5, %v197_v4 }
  0x90   : > { %v210_v8 = vsub.f32 %v203_v6, %v208_v7 }
  0x92   : > { %v212_v9 = vmax.f32 %v210_v8, 0.0 }
  0x93   : > { %v199_v10 = vpop.xlane.xlu0 %198 }
  0x94   : > { %v214_v11 = vmul.f32 0.007874016, %v212_v9  ;;  %v793_v12 = vmul.f32 0.0078125, %v199_v10 }
  0x95   : > { %v205_v13 = vpop.xlane.xlu1 %204 }
  0x96   : > { %621 = vrsqrt.f32 %v214_v11  ;;  %v209_v14 = vmul.f32 %v793_v12, %v199_v10  ;;  %vm223_vm0 = vcmp.eq.f32.partialorder %v214_v11, inf  ;;  %v226_v27 = vand.u32 2147483648, %v214_v11 }
  0x97   : > { %vm225_vm1 = vcmp.eq.f32.partialorder %v214_v11, 0.0 }
  0x98   : > { %v211_v15 = vsub.f32 %v205_v13, %v209_v14 }
  0x9a   : > { %v213_v16 = vmax.f32 %v211_v15, 0.0 }
  0x9c   : > { %v622_v17 = vpop.eup %621  ;;  %v215_v19 = vmul.f32 0.007874016, %v213_v16 }
  0x9d   : > { %v217_v18 = vmul.f32 %v622_v17, %v214_v11 }
  0x9e   : > { %623 = vrsqrt.f32 %v215_v19  ;;  %vm235_vm2 = vcmp.eq.f32.partialorder %v215_v19, inf  ;;  %v238_v36 = vand.u32 2147483648, %v215_v19  ;;  %vm237_vm3 = vcmp.eq.f32.partialorder %v215_v19, 0.0 }
  0x9f   : > { %v218_v20 = vmul.f32 %v622_v17, %v217_v18 }
  0xa1   : > { %v219_v21 = vmul.f32 0.5, %v218_v20 }
  0xa3   : > { %v220_v22 = vsub.f32 1.5, %v219_v21 }
  0xa4   : > { %v624_v23 = vpop.eup %623 }
  0xa5   : > { %v221_v24 = vmul.f32 %v622_v17, %v220_v22  ;;  %v229_v25 = vmul.f32 %v624_v23, %v215_v19 }
  0xa7   : > { %v222_v26 = vmul.f32 %v221_v24, %v214_v11  ;;  %v230_v28 = vmul.f32 %v624_v23, %v229_v25 }
  0xa9   : > { %v224_v29 = vsel %vm223_vm0, %v214_v11, %v222_v26  ;;  %v231_v31 = vmul.f32 0.5, %v230_v28 }
  0xaa   : > { %v227_v30 = vsel %vm225_vm1, %v226_v27, %v224_v29 }
  0xab   : > { %v241_v32 = vadd.f32 1e-06, %v227_v30  ;;  %v232_v33 = vsub.f32 1.5, %v231_v31 }
  0xad   : > { %625 = vrcp.f32 %v241_v32  ;;  %v233_v34 = vmul.f32 %v624_v23, %v232_v33  ;;  %v254_v43 = vand.u32 2147483648, %v241_v32  ;;  %v252_v45 = vand.u32 2147483647, %v241_v32 }
  0xae   : > { %vm248_vm5 = vweird.f32 %v241_v32 }
  0xaf   : > { %v234_v35 = vmul.f32 %v233_v34, %v215_v19  ;;  %v255_v48 = vor.u32 1.1754944e-38, %v254_v43  ;;  %vm253_vm7 = vcmp.eq.f32.partialorder %v252_v45, 8.507059e+37 }
  0xb1   : > { %v236_v37 = vsel %vm235_vm2, %v215_v19, %v234_v35 }
  0xb2   : > { %v239_v39 = vsel %vm237_vm3, %v238_v36, %v236_v37 }
  0xb3   : > { %v626_v38 = vpop.eup %625  ;;  %v242_v41 = vadd.f32 1e-06, %v239_v39 }
  0xb4   : > { %v244_v40 = vmul.f32 %v626_v38, %v241_v32  ;;  %vm249_vm4 = vweird.f32 %v626_v38 }
  0xb5   : > { %627 = vrcp.f32 %v242_v41  ;;  %vm250_vm6 = vmor %vm248_vm5, %vm249_vm4  ;;  %v268_v57 = vand.u32 2147483648, %v242_v41  ;;  %v266_v59 = vand.u32 2147483647, %v242_v41  ;;  %vm262_vm9 = vweird.f32 %v242_v41 }
  0xb6   : > { %v245_v42 = vsub.f32 1.0, %v244_v40 }
  0xb7   : > { %v269_v1 = vor.u32 1.1754944e-38, %v268_v57  ;;  %vm267_vm11 = vcmp.eq.f32.partialorder %v266_v59, 8.507059e+37 }
  0xb8   : > { %v246_v44 = vmul.f32 %v626_v38, %v245_v42 }
  0xba   : > { %v247_v46 = vadd.f32 %v626_v38, %v246_v44 }
  0xbb   : > { %v628_v49 = vpop.eup %627 }
  0xbc   : > { %v251_v50 = vsel %vm250_vm6, %v626_v38, %v247_v46  ;;  %v258_v52 = vmul.f32 %v628_v49, %v242_v41  ;;  %vm263_vm8 = vweird.f32 %v628_v49 }
  0xbd   : > { %v256_v51 = vsel %vm253_vm7, %v255_v48, %v251_v50  ;;  %vm264_vm10 = vmor %vm262_vm9, %vm263_vm8 }
  0xbe   : > { %v272_v53 = vmul.f32 %v271_v47, %v256_v51  ;;  %v259_v55 = vsub.f32 1.0, %v258_v52 }
  0xc0   : > { %v275_v56 = vmul.f32 %v272_v53, %v790_v5  ;;  %v260_v58 = vmul.f32 %v628_v49, %v259_v55  ;;  %v280_v61 = vmul.f32 %v272_v53, %v780_v0 }
  0xc2   : > { %v278_v60 = vsub.f32 %v277_v54, %v275_v56  ;;  %v261_v62 = vadd.f32 %v628_v49, %v260_v58 }
  0xc4   : > { %v282_v63 = vadd.f32 %v280_v61, %v278_v60  ;;  %v265_v3 = vsel %vm264_vm10, %v628_v49, %v261_v62 }
  0xc5   : > { %v270_v4 = vsel %vm267_vm11, %v269_v1, %v265_v3 }
  0xc6   : > { %284 = vst [vmem:[%s805_s6] sm:$0xff] %v282_v63  ;;  %v273_v5 = vmul.f32 %v271_v47, %v270_v4 }
  0xc8   : > { %v276_v6 = vmul.f32 %v273_v5, %v793_v12  ;;  %v281_v8 = vmul.f32 %v273_v5, %v785_v2 }
  0xca   : > { %v279_v7 = vsub.f32 %v277_v54, %v276_v6  ;;  %292 = sbr.rel (!%p768_p4) target bundleno = 246 (0xf6), region = 36 }
  0xcc   : > { %v283_v0 = vadd.f32 %v281_v8, %v279_v7 }
  0xce   : > { %285 = vst [vmem:[%s805_s6 + $0x8] sm:$0xff] %v283_v0 }
  0xcf   : > { %s861_s7 = smov (!%p295_p8, %s294_s7), 2 }
  0xd0   : > { %s515_s12 = sshll.u32 %s861_s7, 3 }
  0xd1   : > { %p518_p9 = scmp.eq.s32.totalorder %s515_s12, 0 }
  0xd2   : > { %s824_s13 = sshrl.u32 (!%p518_p9), %s861_s7, 1 }
  0xd3   : > { %303 = sbr.rel (%p518_p9) target bundleno = 246 (0xf6), region = 40  ;;  %p519_p10 = scmp.le.s32.totalorder (!%p518_p9), %s824_s13, 0 }
  0xd8   : > { %462 = sbr.rel (%p519_p10) target bundleno = 229 (0xe5), region = 116  ;;  %s685_s14 = smov (!%p519_p10), %s818_s11  }
  0xd9   : > { %s689_s15 = smov (!%p519_p10), %s805_s6   ;;  %s693_s16 = smov (!%p519_p10), 0  }
  0xda   : > { %s697_s18 = smov (!%p519_p10), 0  }
  0xdd LB: >> { %v368_v2 = vld [vmem:[%s691_s15] sm:$0xff]  ;;  %v370_v9 = vld [vmem:[%s691_s15 + $0x8] sm:$0xff]  ;;  %s372_s0 = sadd.s32 1, %s695_s16  ;;  %s362_s18 = sadd.s32 1, %s699_s18   ;;  %s699_s18 = sphi %s697_s18, %s362_s18   ;;  %s695_s16 = sphi %s693_s16, %s694_s16   ;;  %s691_s15 = sphi %s689_s15, %s377_s15   ;;  %s687_s14 = sphi %s685_s14, %s378_s14  }
  0xde   : >> { %369 = vst [vmem:[%s687_s14] sm:$0xff] %v368_v2  ;;  %p373_p11 = scmp.ge.s32.totalorder %s372_s0, %s824_s13  ;;  %p361_p12 = scmp.ge.s32.totalorder %s362_s18, %s824_s13 }
  0xdf   : >> { %371 = vst [vmem:[%s687_s14 + $0x8] sm:$0xff] %v370_v9 }
  0xe0   : >> { %s863_s0 = smov (%p373_p11, %s372_s0), 0  ;;  %364 = sbr.rel (!%p361_p12) target bundleno = 221 (0xdd), region = 122 }
  0xe1   : >> { %s520_s19 = sshll.u32 %s863_s0, 4  ;;  %s694_s16 = smov %s863_s0  }
  0xe2   : >> { %s377_s15 = scalar_lea.vmem %s805_s6, %s520_s19 [#allocation4]   ;;  %s378_s14 = scalar_lea.vmem %s818_s11, %s520_s19  }
  0xe5 PF: > { %s834_s20 = sand.u32 1, %s861_s7   ;;  %s531_s22 = sshll.u32 %s824_s13, 4 }
  0xe6   : > { %s383_s23 = scalar_lea.vmem %s805_s6, %s531_s22 [#allocation4]   ;;  %s385_s24 = scalar_lea.vmem %s818_s11, %s531_s22  }
  0xe7   : > { %p525_p13 = scmp.le.s32.totalorder %s834_s20, 0 }
  0xe8   : > { %s701_s25 = smov (!%p525_p13), %s385_s24   ;;  %s705_s26 = smov (!%p525_p13), %s383_s23  }
  0xe9   : > { %476 = sbr.rel (%p525_p13) target bundleno = 246 (0xf6), region = 127  ;;  %s709_s27 = smov (!%p525_p13), 0  }
  0xea   : > { %s713_s28 = smov (!%p525_p13), 0  }
  0xee LB: >> { %v395_v10 = vld [vmem:[%s707_s26] sm:$0xff]  ;;  %s397_s29 = sadd.s32 1, %s711_s27  ;;  %s389_s28 = sadd.s32 1, %s715_s28   ;;  %s715_s28 = sphi %s713_s28, %s389_s28   ;;  %s711_s27 = sphi %s709_s27, %s710_s27   ;;  %s707_s26 = sphi %s705_s26, %s402_s26   ;;  %s703_s25 = sphi %s701_s25, %s403_s25  }
  0xef   : >> { %396 = vst [vmem:[%s703_s25] sm:$0xff] %v395_v10  ;;  %p398_p0 = scmp.ge.s32.totalorder %s397_s29, %s834_s20  ;;  %p388_p1 = scmp.ge.s32.totalorder %s389_s28, %s834_s20 }
  0xf1   : >> { %s865_s29 = smov (%p398_p0, %s397_s29), 0  ;;  %391 = sbr.rel (!%p388_p1) target bundleno = 238 (0xee), region = 133 }
  0xf2   : >> { %s526_s30 = sshll.u32 %s865_s29, 3  ;;  %s710_s27 = smov %s865_s29  }
  0xf3   : >> { %s402_s26 = scalar_lea.vmem %s383_s23, %s526_s30 [#allocation4]   ;;  %s403_s25 = scalar_lea.vmem %s385_s24, %s526_s30  }
  0xf6 PF: > { %p12_p2 = scmp.ge.s32.totalorder %s758_s1, 4   ;;  %s857_s16 = smov %s679_s17 }
  0xf7   : > { %s858_s17 = smov %s766_s21  ;;  %s859_s18 = smov %s758_s1 }
  0xf8   :  { %14 = sbr.rel (!%p12_p2) target bundleno = 5 (0x5), region = 144 }

</bundles_post_ra>
